<compile_context>
chip_gen: v7x
topology: tpu7x:2x2x1
jax: 0.10.0
libtpu: 0.0.40
codegen_flags: <defaults>
</compile_context>

<pallas_src>
import functools

import jax
import jax.numpy as jnp
from jax.experimental import pallas as pl
from jax.experimental.pallas import tpu as pltpu

_LANES = 128
_SUBLANE_MULT = 32   # rows multiple of 32 satisfies f32 / bf16 / int8 tiling


def _cdiv(a, b):
    return (a + b - 1) // b


def _round_up(a, b):
    return _cdiv(a, b) * b


def _pick_block_rows_and_vmem_limit():
    """Per-generation default block rows and optional scoped-VMEM override."""
    try:
        cap = int(pltpu.get_tpu_info().vmem_capacity_bytes)
    except Exception:
        return 4096, None                    # unknown backend: fits every default
    if cap >= 96 * 1024 * 1024:              # v5e / v6e / v5p class (128 MiB physical)
        return 8192, 64 * 1024 * 1024        # v5e's scoped default is only 16 MiB
    if cap >= 48 * 1024 * 1024:              # v7x class (64 MiB physical)
        return 8192, None                    # 24 MiB weighted double-buffer fits 32 MiB default
    return 2048, None                        # small-VMEM chips (v2/v3 class)


def _num_tensorcores():
    """Best-effort TensorCore count for the leading 'parallel' grid axis."""
    try:
        dev = jax.devices()[0]
    except Exception:
        return 1
    for attr in ("num_cores", "core_count"):
        v = getattr(dev, attr, None)
        try:
            v = int(v)
        except (TypeError, ValueError):
            continue
        if v >= 1:
            return min(v, 4)
    return 2   # harmless (one extra cheap part) on single-core chips


def _rmse_partial_sum_kernel(has_weight, blocks_per_part, last_block, rows, br,
                             *refs):
    """Accumulates sum((x - y)^2 [* w]) for one 'part' of the row blocks."""
    if has_weight:
        x_ref, y_ref, w_ref, o_ref, acc_ref = refs
    else:
        x_ref, y_ref, o_ref, acc_ref = refs
        w_ref = None

    p = pl.program_id(0)
    i = pl.program_id(1)

    @pl.when(i == 0)
    def _():
        acc_ref[...] = jnp.zeros_like(acc_ref)

    logical_block = p * blocks_per_part + i          # un-clamped block index
    tail_rows = rows - last_block * br               # valid rows in final block (static)
    tail_is_partial = tail_rows < br                 # static python bool

    def accumulate(masked):
        x = x_ref[...].astype(jnp.float32)
        y = y_ref[...].astype(jnp.float32)
        d = x - y
        loss = d * d
        if has_weight:
            loss = loss * w_ref[...].astype(jnp.float32)
        if masked:
            # Only the final (partial) block pays for the mask.  Row-level
            # compare (not a flat element index) -> no int32 overflow.
            row_idx = jax.lax.broadcasted_iota(jnp.int32, (br, _LANES), 0)
            loss = jnp.where(row_idx < tail_rows, loss, 0.0)
        # Fold (br, 128) -> (8, 128): tile-aligned reshape + leading-axis sum
        # (pure VPU adds); the accumulator stays a single vreg.
        acc_ref[...] += jnp.sum(loss.reshape(br // 8, 8, _LANES), axis=0)

    if last_block > 0:
        @pl.when(logical_block < last_block)
        def _():
            accumulate(masked=False)                 # hot path: no mask

    @pl.when(logical_block == last_block)
    def _():
        accumulate(masked=tail_is_partial)

    # logical_block > last_block (clamped duplicate when blocks do not split
    # evenly across parts): contributes nothing.

    @pl.when(i == blocks_per_part - 1)
    def _():
        # Single cross-lane/sublane reduce of one vreg per part.
        o_ref[0, 0] = jnp.sum(acc_ref[...])


def rmse_loss(inp, target, lds_weight=None, *, block_rows=None, num_parts=None):
    """sqrt(mean((inp - target)^2 [* lds_weight])) via a Pallas TPU kernel."""
    inp = jnp.asarray(inp)
    target = jnp.asarray(target)
    assert inp.shape == target.shape
    n = int(inp.size)
    if n == 0:
        # Matches torch.mean of an empty tensor (nan) -> sqrt(nan) = nan.
        return jnp.array(jnp.nan, jnp.float32)

    arrays = [inp.reshape(-1), target.reshape(-1)]
    has_weight = lds_weight is not None
    if has_weight:
        w = jnp.asarray(lds_weight).reshape(-1)
        assert w.shape[0] == n
        arrays.append(w)

    # 2-D (rows, 128) view.  Zero-copy when n % 128 == 0; otherwise zero-pad
    # only to the next multiple of 128 (padded zeros contribute 0 to the sum).
    rem = (-n) % _LANES
    if rem:
        # TODO(synk): for very large ragged N this is still one HBM copy per
        # input; a 1-D-block / manual-DMA path would remove it entirely.
        arrays = [jnp.pad(a, (0, rem)) for a in arrays]
    rows = (n + rem) // _LANES
    arrays = [a.reshape(rows, _LANES) for a in arrays]

    if block_rows is None:
        block_rows, vmem_limit = _pick_block_rows_and_vmem_limit()
    else:
        vmem_limit = None
    br = min(int(block_rows), _round_up(rows, _SUBLANE_MULT))
    br = max(_SUBLANE_MULT, _round_up(br, _SUBLANE_MULT))

    num_blocks = _cdiv(rows, br)
    if num_parts is None:
        num_parts = _num_tensorcores()
    num_parts = max(1, min(int(num_parts), num_blocks))
    blocks_per_part = _cdiv(num_blocks, num_parts)
    last_block = num_blocks - 1

    def in_map(p, i):
        # Clamp so a duplicate-of-last block (skipped in-kernel) is fetched
        # instead of DMA-ing past the end of the array.
        return (jnp.minimum(p * blocks_per_part + i, last_block), 0)

    in_specs = [pl.BlockSpec((br, _LANES), in_map) for _ in arrays]
    out_spec = pl.BlockSpec((1, 1), lambda p, i: (p, 0),
                            memory_space=pltpu.SMEM)

    cp_kwargs = dict(dimension_semantics=("parallel", "arbitrary"))
    if vmem_limit is not None:
        cp_kwargs["vmem_limit_bytes"] = int(vmem_limit)

    kernel = functools.partial(_rmse_partial_sum_kernel, has_weight,
                               blocks_per_part, last_block, rows, br)
    partial_sums = pl.pallas_call(
        kernel,
        out_shape=jax.ShapeDtypeStruct((num_parts, 1), jnp.float32),
        grid_spec=pltpu.PrefetchScalarGridSpec(
            num_scalar_prefetch=0,
            grid=(num_parts, blocks_per_part),
            in_specs=in_specs,
            out_specs=out_spec,
            scratch_shapes=[pltpu.VMEM((8, _LANES), jnp.float32)],
        ),
        compiler_params=pltpu.CompilerParams(**cp_kwargs),
    )(*arrays)

    # Combine the (at most num_parts) partial sums, divide by true N, sqrt.
    return jnp.sqrt(jnp.sum(partial_sums) / jnp.float32(n))


if __name__ == "__main__":
    key = jax.random.PRNGKey(0)
    k1, k2, k3 = jax.random.split(key, 3)

    # Small shapes consistent with the module's forward: (N, 1) columns.
    N = 16
    inp = jax.random.normal(k1, (N, 1), jnp.float32)
    target = jax.random.normal(k2, (N, 1), jnp.float32)
    lds_weight = jax.random.uniform(k3, (N, 1), jnp.float32)

    # Weighted path.
    loss_w = jax.block_until_ready(rmse_loss(inp, target, lds_weight))
    ref_w = jnp.sqrt(jnp.mean((inp - target) ** 2 * lds_weight))
    assert jnp.allclose(loss_w, ref_w, rtol=1e-5, atol=1e-6), (loss_w, ref_w)

    # Unweighted path (specialized 2-input kernel, no ones() stream).
    loss_nw = jax.block_until_ready(rmse_loss(inp, target))
    ref_nw = jnp.sqrt(jnp.mean((inp - target) ** 2))
    assert jnp.allclose(loss_nw, ref_nw, rtol=1e-5, atol=1e-6), (loss_nw, ref_nw)

    # Ragged N (not a multiple of 128) with tiny blocks: exercises multi-block,
    # two-part, and masked partial-final-block paths at small cost.
    N2 = 5000
    k4, k5, k6 = jax.random.split(k3, 3)
    inp2 = jax.random.normal(k4, (N2, 1), jnp.float32)
    target2 = jax.random.normal(k5, (N2, 1), jnp.float32)
    w2 = jax.random.uniform(k6, (N2, 1), jnp.float32)
    loss2 = jax.block_until_ready(
        rmse_loss(inp2, target2, w2, block_rows=32, num_parts=2))
    ref2 = jnp.sqrt(jnp.mean((inp2 - target2) ** 2 * w2))
    assert jnp.allclose(loss2, ref2, rtol=1e-5, atol=1e-6), (loss2, ref2)

    loss2_nw = jax.block_until_ready(
        rmse_loss(inp2, target2, block_rows=32, num_parts=2))
    ref2_nw = jnp.sqrt(jnp.mean((inp2 - target2) ** 2))
    assert jnp.allclose(loss2_nw, ref2_nw, rtol=1e-5, atol=1e-6), (loss2_nw, ref2_nw)

    # Odd block count split over 2 parts: exercises the clamped-duplicate skip.
    N3 = 96 * 128
    k7, k8 = jax.random.split(k6, 2)
    inp3 = jax.random.normal(k7, (N3, 1), jnp.float32)
    target3 = jax.random.normal(k8, (N3, 1), jnp.float32)
    loss3 = jax.block_until_ready(
        rmse_loss(inp3, target3, block_rows=32, num_parts=2))
    ref3 = jnp.sqrt(jnp.mean((inp3 - target3) ** 2))
    assert jnp.allclose(loss3, ref3, rtol=1e-5, atol=1e-6), (loss3, ref3)

    # bf16 inputs: stream in bf16, upcast to f32 per block inside the kernel.
    N4 = 4100
    k9, k10, k11 = jax.random.split(k8, 3)
    inp4 = jax.random.normal(k9, (N4, 1), jnp.float32).astype(jnp.bfloat16)
    target4 = jax.random.normal(k10, (N4, 1), jnp.float32).astype(jnp.bfloat16)
    w4 = jax.random.uniform(k11, (N4, 1), jnp.float32).astype(jnp.bfloat16)
    loss4 = jax.block_until_ready(rmse_loss(inp4, target4, w4))
    ref4 = jnp.sqrt(jnp.mean(
        (inp4.astype(jnp.float32) - target4.astype(jnp.float32)) ** 2
        * w4.astype(jnp.float32)))
    assert jnp.allclose(loss4, ref4, rtol=1e-4, atol=1e-6), (loss4, ref4)

    print("KERNEL_OK")
</pallas_src>

<mosaic_0001>
module attributes {stable_mosaic.version = 11 : i64} {
  func.func @_rmse_partial_sum_kernel(%arg0: i32, %arg1: i32, %arg2: memref<32x128xf32, #tpu.memory_space<vmem>>, %arg3: memref<32x128xf32, #tpu.memory_space<vmem>>, %arg4: memref<32x128xf32, #tpu.memory_space<vmem>>, %arg5: memref<1x1xf32, #tpu.memory_space<smem>>, %arg6: memref<8x128xf32, #tpu.memory_space<vmem>>) attributes {dimension_semantics = [#tpu.dimension_semantics<parallel>, #tpu.dimension_semantics<arbitrary>], iteration_bounds = array<i64: 1, 1>, scalar_prefetch = 0 : i64, scratch_operands = 1 : i64, tpu.core_type = #tpu.core_type<tc>, window_params = [{transform_indices = @transform_0, window_bounds = array<i64: 32, 128>}, {transform_indices = @transform_1, window_bounds = array<i64: 32, 128>}, {transform_indices = @transform_2, window_bounds = array<i64: 32, 128>}, {transform_indices = @transform_3, window_bounds = array<i64: 1, 1>}]} {
    %c0_i32 = arith.constant 0 : i32
    %0 = arith.cmpi eq, %arg1, %c0_i32 : i32
    %1 = arith.extui %0 : i1 to i32
    %c0_i32_0 = arith.constant 0 : i32
    %2 = arith.cmpi ne, %1, %c0_i32_0 : i32
    scf.if %2 {
      %cst = arith.constant 0.000000e+00 : f32
      %11 = vector.broadcast %cst : f32 to vector<8x128xf32>
      %c0 = arith.constant 0 : index
      %c0_5 = arith.constant 0 : index
      %12 = vector.load %arg6[%c0, %c0_5] : memref<8x128xf32, #tpu.memory_space<vmem>>, vector<8x128xf32>
      tpu.vector_store %arg6[%c0, %c0_5], %11 {strides = array<i32>} : memref<8x128xf32, #tpu.memory_space<vmem>>, vector<8x128xf32>,
    } else {
    }
    %c1_i32 = arith.constant 1 : i32
    %3 = arith.muli %arg0, %c1_i32 : i32
    %4 = arith.addi %3, %arg1 : i32
    %c0_i32_1 = arith.constant 0 : i32
    %5 = arith.cmpi eq, %4, %c0_i32_1 : i32
    %6 = arith.extui %5 : i1 to i32
    %c0_i32_2 = arith.constant 0 : i32
    %7 = arith.cmpi ne, %6, %c0_i32_2 : i32
    scf.if %7 {
      %c0 = arith.constant 0 : index
      %c0_5 = arith.constant 0 : index
      %11 = vector.load %arg2[%c0, %c0_5] : memref<32x128xf32, #tpu.memory_space<vmem>>, vector<32x128xf32>
      %c0_6 = arith.constant 0 : index
      %c0_7 = arith.constant 0 : index
      %12 = vector.load %arg3[%c0_6, %c0_7] : memref<32x128xf32, #tpu.memory_space<vmem>>, vector<32x128xf32>
      %13 = arith.subf %11, %12 : vector<32x128xf32>
      %14 = arith.mulf %13, %13 : vector<32x128xf32>
      %c0_8 = arith.constant 0 : index
      %c0_9 = arith.constant 0 : index
      %15 = vector.load %arg4[%c0_8, %c0_9] : memref<32x128xf32, #tpu.memory_space<vmem>>, vector<32x128xf32>
      %16 = arith.mulf %14, %15 : vector<32x128xf32>
      %17 = tpu.iota {dimensions = array<i32: 0>} : vector<32x128xi32>
      %c1_i32_10 = arith.constant 1 : i32
      %18 = vector.broadcast %c1_i32_10 : i32 to vector<32x128xi32>
      %19 = arith.cmpi slt, %17, %18 : vector<32x128xi32>
      %cst = arith.constant 0.000000e+00 : f32
      %20 = vector.broadcast %cst : f32 to vector<32x128xf32>
      %21 = arith.select %19, %16, %20 : vector<32x128xi1>, vector<32x128xf32>
      %c0_11 = arith.constant 0 : index
      %c0_12 = arith.constant 0 : index
      %22 = vector.load %arg6[%c0_11, %c0_12] : memref<8x128xf32, #tpu.memory_space<vmem>>, vector<8x128xf32>
      %23 = vector.shape_cast %21 : vector<32x128xf32> to vector<4x8x128xf32>
      %cst_13 = arith.constant dense<0.000000e+00> : vector<8x128xf32>
      %24 = vector.multi_reduction <add>, %23, %cst_13 [0] : vector<4x8x128xf32> to vector<8x128xf32>
      %25 = arith.addf %22, %24 : vector<8x128xf32>
      %c0_14 = arith.constant 0 : index
      %c0_15 = arith.constant 0 : index
      %26 = vector.load %arg6[%c0_14, %c0_15] : memref<8x128xf32, #tpu.memory_space<vmem>>, vector<8x128xf32>
      tpu.vector_store %arg6[%c0_14, %c0_15], %25 {strides = array<i32>} : memref<8x128xf32, #tpu.memory_space<vmem>>, vector<8x128xf32>,
    } else {
    }
    %c0_i32_3 = arith.constant 0 : i32
    %8 = arith.cmpi eq, %arg1, %c0_i32_3 : i32
    %9 = arith.extui %8 : i1 to i32
    %c0_i32_4 = arith.constant 0 : i32
    %10 = arith.cmpi ne, %9, %c0_i32_4 : i32
    scf.if %10 {
      %c0 = arith.constant 0 : index
      %c0_5 = arith.constant 0 : index
      %11 = vector.load %arg6[%c0, %c0_5] : memref<8x128xf32, #tpu.memory_space<vmem>>, vector<8x128xf32>
      %12 = vector.shape_cast %11 : vector<8x128xf32> to vector<1x8x128xf32>
      %cst = arith.constant dense<0.000000e+00> : vector<1xf32>
      %13 = vector.multi_reduction <add>, %12, %cst [1, 2] : vector<1x8x128xf32> to vector<1xf32>
      %14 = vector.shape_cast %13 : vector<1xf32> to vector<1x1x1xf32>
      %15 = vector.extract %14[0, 0, 0] : f32 from vector<1x1x1xf32>
      %c0_6 = arith.constant 0 : index
      %c0_7 = arith.constant 0 : index
      %16 = memref.load %arg5[%c0_6, %c0_7] : memref<1x1xf32, #tpu.memory_space<smem>>
      memref.store %15, %arg5[%c0_6, %c0_7] : memref<1x1xf32, #tpu.memory_space<smem>>
    } else {
    }
    return
  }
  func.func @transform_0(%arg0: i32, %arg1: i32) -> (i32, i32) {
    %c1_i32 = arith.constant 1 : i32
    %0 = arith.muli %arg0, %c1_i32 : i32
    %1 = arith.addi %0, %arg1 : i32
    %c0_i32 = arith.constant 0 : i32
    %2 = arith.minsi %1, %c0_i32 : i32
    %c0_i32_0 = arith.constant 0 : i32
    %c0_i32_1 = arith.constant 0 : i32
    return %2, %c0_i32_0 : i32, i32
  }
  func.func @transform_1(%arg0: i32, %arg1: i32) -> (i32, i32) {
    %c1_i32 = arith.constant 1 : i32
    %0 = arith.muli %arg0, %c1_i32 : i32
    %1 = arith.addi %0, %arg1 : i32
    %c0_i32 = arith.constant 0 : i32
    %2 = arith.minsi %1, %c0_i32 : i32
    %c0_i32_0 = arith.constant 0 : i32
    %c0_i32_1 = arith.constant 0 : i32
    return %2, %c0_i32_0 : i32, i32
  }
  func.func @transform_2(%arg0: i32, %arg1: i32) -> (i32, i32) {
    %c1_i32 = arith.constant 1 : i32
    %0 = arith.muli %arg0, %c1_i32 : i32
    %1 = arith.addi %0, %arg1 : i32
    %c0_i32 = arith.constant 0 : i32
    %2 = arith.minsi %1, %c0_i32 : i32
    %c0_i32_0 = arith.constant 0 : i32
    %c0_i32_1 = arith.constant 0 : i32
    return %2, %c0_i32_0 : i32, i32
  }
  func.func @transform_3(%arg0: i32, %arg1: i32) -> (i32, i32) {
    %c0_i32 = arith.constant 0 : i32
    %c0_i32_0 = arith.constant 0 : i32
    return %arg0, %c0_i32 : i32, i32
  }
}

</mosaic_0001>

<bundles_post_ra>
// kernel: tpu_custom_call.1
= control target key start
LH: loop header
LB: loop body
LE: loop exit
PB: predicated region body
PF: predicated region fallthrough
CT: control target
= control target key end

     0   :  { %8 = vsyncpa [#allocation4], 0  ;;  %s308_s0 = inlined_call_operand.hbm [shape: f32[1,128], index: 0, kind: input, shape index: {}]   ;;  %s309_s1 = inlined_call_operand.vmem [shape: f32[1,128], index: 1, kind: input, shape index: {}]   ;;  %s310_s2 = inlined_call_operand.vmem [shape: f32[1,128], index: 2, kind: input, shape index: {}]   ;;  %s311_s3 = inlined_call_operand.hbm [shape: f32[1,1], index: 3, kind: output, shape index: {}]  }
   0x1   :  { %9 = vsyncpa [#allocation5], 0 }
   0x2   :  { %20 = vsyncadd [#allocation4], 496  ;;  %s254_s12 = smov [#allocation3]   ;;  %s218_s16 = scalar_lea.hbm %s308_s0, 16 }
   0x3   :  { %s24_s13 = sshll.u32 %s254_s12, 4  ;;  %p219_p0 = scmp.ne.s32.totalorder %s308_s0, %s218_s16  ;;  %s25_s13 = int_to_ptr.vmem [resolvable:$true] %s24_s13 }
   0x4   :  { %p222_p1 = scmp.lt.u32.totalorder %s218_s16, %s308_s0 }
   0x6   :  { %p224_p2 = pnand %p222_p1, %p219_p0 }
   0x8   :  { %227 = shalt.err (!%p224_p2)
}
   0x9   :  { %s228_s21 = scalar_lea.vmem %s25_s13, 16  ;;  %s232_s22 = scalar_lea.vmem %s25_s13, 512 }
   0xa   :  { %p229_p3 = scmp.ne.s32.totalorder %s25_s13, %s228_s21  ;;  %p233_p4 = scmp.lt.s32.totalorder %s25_s13, %s25_s13 }
   0xb   :  { %p234_p5 = scmp.lt.s32.totalorder %s232_s22, %s228_s21 }
   0xd   :  { %p235_p6 = por %p234_p5, %p233_p4 }
   0xf   :  { %p236_p7 = pnand %p235_p6, %p229_p3 }
  0x11   :  { %239 = shalt.err (!%p236_p7)
}
  0x12   :  { %s255_s23 = smov 16   ;;  %s256_s24 = smov 1  }
  0x13   :  { %30 = dma.hbm_to_vmem [thread:$0]  %s308_s0, 16, %s25_s13, [#allocation4], %s255_s23, %s255_s23, %s256_s24  }
  0x14   :  { %250 = dma.done.wait [#allocation4], 512  }
  0x15   :  { %251 = vsyncadd [#allocation4], 4294966784  ;;  %v156_v0 = vlaneseq  ;;  %v132_v1 = vld [vmem:[#allocation3] sm:$0xff]  ;;  %s240_s5 = scalar_lea.hbm %s311_s3, 16 }
  0x16   :  { %v136_v2 = vld [vmem:[%s309_s1] sm:$0xff]  ;;  %p241_p8 = scmp.ne.s32.totalorder %s311_s3, %s240_s5  ;;  %p244_p9 = scmp.lt.u32.totalorder %s240_s5, %s311_s3 }
  0x17   :  { %v157_v3 = vshrl.u32 %v156_v0, 7  ;;  %v140_v4 = vsub.f32 %v132_v1, %v136_v2  ;;  %v148_v5 = vld [vmem:[%s310_s2] sm:$0xff] }
  0x18   :  { %p246_p10 = pnand %p244_p9, %p241_p8 }
  0x19   :  { %v144_v6 = vmul.f32 %v140_v4, %v140_v4  ;;  %vm161_vm0 = vcmp.lt.s32.totalorder %v157_v3, 1 }
  0x1b   :  { %v152_v7 = vmul.f32 %v148_v5, %v144_v6 }
  0x1d   :  { %v165_v8 = vsel %vm161_vm0, %v152_v7, 0.0 }
  0x1e   :  { %179 = vadd.xlane.f32.xlu0 %v165_v8 }
  0xab   :  { %v180_v9 = vpop.xlane.xlu0 %179 }
  0xac   :  { %v181_v10 = vrot.slane %v180_v9, 4 }
  0xae   :  { %v182_v11 = vadd.f32 %v181_v10, %v180_v9 }
  0xb0   :  { %v183_v12 = vrot.slane %v182_v11, 2 }
  0xb2   :  { %v184_v13 = vadd.f32 %v183_v12, %v182_v11 }
  0xb4   :  { %v185_v14 = vrot.slane %v184_v13, 1 }
  0xb6   :  { %v186_v15 = vadd.f32 %v185_v14, %v184_v13 }
  0xb8   :  { %212 = vpush %v186_v15 }
  0xe9   :  { %s213_s0 = spop %212 }
  0xea   :  { %189 = sst [smem:[#allocation6]] %s213_s0 }
  0xeb   :  { %249 = shalt.err (!%p246_p10)
}
  0xec   :  { %s257_s9 = smov [#allocation6]  }
  0xed   :  { %197 = dma.smem_to_hbm %s257_s9, 16, %s311_s3, [#allocation5]  }
  0xee   :  { %252 = dma.done.wait [#allocation5], 16  }
  0xef   :  { %253 = vsyncadd [#allocation5], 4294967280 }
  0xf0   :  { %201 = sfence }
  0xf1   :  { %202 = vsyncpa [#allocation4], 1 }
  0xf2   :  { %203 = vsyncpa [#allocation5], 1 }

</bundles_post_ra>
